<compile_context>
chip_gen: v5e
topology: v5e:2x2
jax: 0.10.0
libtpu: 0.0.40
codegen_flags: <defaults>
</compile_context>

<pallas_src>
import numpy as np
import jax
import jax.numpy as jnp
from jax.experimental import pallas as pl
from jax.experimental.pallas import tpu as pltpu

ACT_DTYPE = jnp.bfloat16          # inter-layer activation storage dtype
MXU_DTYPE = jnp.bfloat16          # matmul operand dtype (accumulation is f32)
VMEM_LIMIT_BYTES = 32 * 1024 * 1024


# ----------------------------------------------------------------------------
# Bilinear 2x upsample (align_corners=True)
# ----------------------------------------------------------------------------
def _interp_coeffs_np(n_in, n_out):
    """PyTorch align_corners=True source coordinates -> (i0, frac), trace-time numpy."""
    src = np.arange(n_out, dtype=np.float64) * (n_in - 1) / (n_out - 1)
    i0 = np.clip(np.floor(src).astype(np.int64), 0, n_in - 2)
    frac = (src - i0).astype(np.float32)
    return i0.astype(np.int32), frac


def _make_upsample_kernel(C, OW, iw0, fw):
    iw0 = [int(v) for v in iw0]
    fw = [float(v) for v in fw]

    def kernel(ah_ref, x_ref, o_ref):
        # ah_ref: (OH, H) bf16 height-interp matrix (resident)
        # x_ref : (H, W*C) bf16 one batch item (wrapper reshape, free in HBM)
        # o_ref : (OH, OW*C)
        # Height pass: one lane-dense MXU matmul, f32 accumulation.
        u = jnp.dot(ah_ref[...], x_ref[...], preferred_element_type=jnp.float32)
        # Width pass: statically unrolled 2-tap blend on static lane slices (VPU).
        cols = []
        for ow in range(OW):
            i0, f = iw0[ow], fw[ow]
            left = u[:, i0 * C:(i0 + 1) * C]
            if f <= 0.0:
                cols.append(left)
            elif f >= 1.0:
                cols.append(u[:, (i0 + 1) * C:(i0 + 2) * C])
            else:
                right = u[:, (i0 + 1) * C:(i0 + 2) * C]
                cols.append((1.0 - f) * left + f * right)
        o_ref[...] = jnp.concatenate(cols, axis=-1).astype(o_ref.dtype)

    return kernel


def bilinear_up2x(x):
    """x: (N, H, W, C) -> (N, 2H, 2W, C), bilinear, align_corners=True."""
    N, H, W, C = x.shape
    OH, OW = 2 * H, 2 * W

    ih0, fh = _interp_coeffs_np(H, OH)
    ah = np.zeros((OH, H), np.float32)
    rows = np.arange(OH)
    ah[rows, ih0] += 1.0 - fh
    ah[rows, ih0 + 1] += fh
    ah = jnp.asarray(ah).astype(MXU_DTYPE)            # (OH, H), resident weights

    iw0, fw = _interp_coeffs_np(W, OW)
    x2 = x.reshape(N, H, W * C)                        # free HBM metadata reshape

    out = pl.pallas_call(
        _make_upsample_kernel(C, OW, iw0, fw),
        out_shape=jax.ShapeDtypeStruct((N, OH, OW * C), ACT_DTYPE),
        grid=(N,),
        in_specs=[
            pl.BlockSpec((OH, H), lambda n: (0, 0)),
            pl.BlockSpec((None, H, W * C), lambda n: (n, 0, 0)),
        ],
        out_specs=pl.BlockSpec((None, OH, OW * C), lambda n: (n, 0, 0)),
        compiler_params=pltpu.CompilerParams(
            dimension_semantics=("parallel",),
            vmem_limit_bytes=VMEM_LIMIT_BYTES),
    )(ah, x2)
    return out.reshape(N, OH, OW, C)


# ----------------------------------------------------------------------------
# Conv3x3 (padding=1) + folded BatchNorm affine + ReLU (dx-fused im2col in VMEM)
# ----------------------------------------------------------------------------
def _fill_xcat(xcat_ref, x_ref):
    """Build the dx-fused im2col scratch: xcat[a, w, dx*Cin+ci] = x_pad[a, w+dx, ci]."""
    H, W, Cin = x_ref.shape
    dt = xcat_ref.dtype
    # Zero only the true padding cells (top/bottom rows + left/right boundary columns);
    # the segment stores below overwrite everything else.
    zrow = jnp.zeros((1, W, 3 * Cin), dt)
    xcat_ref[0:1] = zrow
    xcat_ref[H + 1:H + 2] = zrow
    zcol = jnp.zeros((H, 1, 3 * Cin), dt)
    xcat_ref[1:H + 1, 0:1, :] = zcol
    xcat_ref[1:H + 1, W - 1:W, :] = zcol

    x = x_ref[...].astype(dt)
    xcat_ref[1:H + 1, :, Cin:2 * Cin] = x                         # dx = 1 (center)
    xcat_ref[1:H + 1, 1:W, 0:Cin] = x[:, 0:W - 1, :]              # dx = 0 (left tap)
    xcat_ref[1:H + 1, 0:W - 1, 2 * Cin:3 * Cin] = x[:, 1:W, :]    # dx = 2 (right tap)


def _conv3x3_core(xcat_ref, w_ref, scale_ref, shift_ref, n_out):
    """3 MXU matmuls (K = 3*Cin), f32 accumulation, fused BN affine + ReLU epilogue."""
    Hp2, W, K = xcat_ref.shape
    H = Hp2 - 2
    s = xcat_ref[...]                                  # bf16, fed straight to the MXU
    acc = jnp.zeros((H * W, n_out), jnp.float32)
    for dy in range(3):
        lhs = s[dy:dy + H].reshape(H * W, K)           # axis-0 slice + aligned reshape
        acc = acc + jnp.dot(lhs, w_ref[dy], preferred_element_type=jnp.float32)
    y = acc * scale_ref[...] + shift_ref[...]
    return jnp.maximum(y, 0.0)


def _conv3x3_bn_relu_kernel(x_ref, w_ref, scale_ref, shift_ref, o_ref, xcat_ref):
    # x_ref : (H, W, Cin) bf16 (unpadded; padding lives only in the VMEM scratch)
    # w_ref : (3, 3*Cin, TCout) bf16 dx-fused weights
    # scale_ref / shift_ref: (1, TCout) f32 folded-BN affine
    # o_ref : (H*W, TCout) flat lane-dense output block
    # xcat_ref: VMEM scratch (H+2, W, 3*Cin), built once per image (j == 0), reused per j.
    @pl.when(pl.program_id(1) == 0)
    def _():
        _fill_xcat(xcat_ref, x_ref)

    y = _conv3x3_core(xcat_ref, w_ref, scale_ref, shift_ref, o_ref.shape[-1])
    o_ref[...] = y.astype(o_ref.dtype)


def conv3x3_bn_relu(x, w, scale, shift):
    """x: (N, H, W, Cin) NHWC; w: (3, 3, Cin, Cout) HWIO; scale/shift: (Cout,)."""
    N, H, W, Cin = x.shape
    Cout = w.shape[-1]
    tcout = 128 if (Cout % 128 == 0) else Cout
    J = Cout // tcout

    w2 = w.reshape(3, 3 * Cin, Cout).astype(MXU_DTYPE)     # dx-fused K axis
    scale2 = scale.reshape(1, Cout).astype(jnp.float32)
    shift2 = shift.reshape(1, Cout).astype(jnp.float32)

    out = pl.pallas_call(
        _conv3x3_bn_relu_kernel,
        out_shape=jax.ShapeDtypeStruct((N, H * W, Cout), ACT_DTYPE),
        grid=(N, J),
        in_specs=[
            pl.BlockSpec((None, H, W, Cin), lambda n, j: (n, 0, 0, 0)),
            pl.BlockSpec((3, 3 * Cin, tcout), lambda n, j: (0, 0, j)),
            pl.BlockSpec((1, tcout), lambda n, j: (0, j)),
            pl.BlockSpec((1, tcout), lambda n, j: (0, j)),
        ],
        out_specs=pl.BlockSpec((None, H * W, tcout), lambda n, j: (n, 0, j)),
        scratch_shapes=[pltpu.VMEM((H + 2, W, 3 * Cin), ACT_DTYPE)],
        compiler_params=pltpu.CompilerParams(
            # j must be sequential per image (scratch built at j == 0, reused for j > 0).
            dimension_semantics=("parallel", "arbitrary"),
            vmem_limit_bytes=VMEM_LIMIT_BYTES),
    )(x, w2, scale2, shift2)
    return out.reshape(N, H, W, Cout)                      # free HBM metadata reshape


# ----------------------------------------------------------------------------
# Last conv3x3+BN+ReLU with the 1x1-conv logits head fused into the epilogue.
# Only the lane-dense (1, H*W) logits row is written to HBM (the big activation never is).
# ----------------------------------------------------------------------------
def _conv3x3_bn_relu_head_kernel(x_ref, w_ref, scale_ref, shift_ref,
                                 wh_ref, bh_ref, o_ref, xcat_ref):
    _fill_xcat(xcat_ref, x_ref)
    y = _conv3x3_core(xcat_ref, w_ref, scale_ref, shift_ref, scale_ref.shape[-1])
    # 1x1-conv head: (1, C) x (H*W, C)^T -> lane-dense (1, H*W) logits.
    logits = jax.lax.dot_general(
        wh_ref[...], y.astype(wh_ref.dtype),
        dimension_numbers=(((1,), (1,)), ((), ())),
        preferred_element_type=jnp.float32)
    o_ref[...] = logits + bh_ref[...]


def conv3x3_bn_relu_head(x, w, scale, shift, wh, bh):
    """Fused [conv3x3+BN+ReLU -> conv1x1] head.  Returns logits (N, H, W, 1) f32."""
    N, H, W, Cin = x.shape
    Cout = w.shape[-1]
    assert Cout == (128 if Cout % 128 == 0 else Cout)      # single Cout tile expected
    HW = H * W

    w2 = w.reshape(3, 3 * Cin, Cout).astype(MXU_DTYPE)
    scale2 = scale.reshape(1, Cout).astype(jnp.float32)
    shift2 = shift.reshape(1, Cout).astype(jnp.float32)
    wh2 = wh.reshape(1, Cout).astype(MXU_DTYPE)
    bh2 = bh.reshape(1, 1).astype(jnp.float32)

    out = pl.pallas_call(
        _conv3x3_bn_relu_head_kernel,
        out_shape=jax.ShapeDtypeStruct((N, 1, HW), jnp.float32),
        grid=(N,),
        in_specs=[
            pl.BlockSpec((None, H, W, Cin), lambda n: (n, 0, 0, 0)),
            pl.BlockSpec((3, 3 * Cin, Cout), lambda n: (0, 0, 0)),
            pl.BlockSpec((1, Cout), lambda n: (0, 0)),
            pl.BlockSpec((1, Cout), lambda n: (0, 0)),
            pl.BlockSpec((1, Cout), lambda n: (0, 0)),
            pl.BlockSpec((1, 1), lambda n: (0, 0)),
        ],
        out_specs=pl.BlockSpec((None, 1, HW), lambda n: (n, 0, 0)),
        scratch_shapes=[pltpu.VMEM((H + 2, W, 3 * Cin), ACT_DTYPE)],
        compiler_params=pltpu.CompilerParams(
            dimension_semantics=("parallel",),
            vmem_limit_bytes=VMEM_LIMIT_BYTES),
    )(x, w2, scale2, shift2, wh2, bh2)
    return out.reshape(N, H, W, 1)


# ----------------------------------------------------------------------------
# Parameters (deterministic, in-script) and forward
# ----------------------------------------------------------------------------
def _conv_bn_params(key, cin, cout, eps=1e-5):
    k = jax.random.split(key, 6)
    w = jax.random.normal(k[0], (3, 3, cin, cout), jnp.float32) / jnp.sqrt(9.0 * cin)
    b = 0.01 * jax.random.normal(k[1], (cout,), jnp.float32)
    gamma = 1.0 + 0.1 * jax.random.normal(k[2], (cout,), jnp.float32)
    beta = 0.1 * jax.random.normal(k[3], (cout,), jnp.float32)
    r_mean = 0.1 * jax.random.normal(k[4], (cout,), jnp.float32)
    r_var = 1.0 + 0.1 * jnp.abs(jax.random.normal(k[5], (cout,), jnp.float32))
    scale = gamma * jax.lax.rsqrt(r_var + eps)
    shift = beta + scale * (b - r_mean)          # BN(conv + b) folded into affine
    return (w, scale, shift)


def init_masknet_params(key, in_channels):
    keys = jax.random.split(key, 5)
    params = {
        "b1c1": _conv_bn_params(keys[0], in_channels, 256),
        "b1c2": _conv_bn_params(keys[1], 256, 256),
        "b2c1": _conv_bn_params(keys[2], 256, 128),
        "b2c2": _conv_bn_params(keys[3], 128, 128),
    }
    kw, kb = jax.random.split(keys[4])
    params["last_w"] = jax.random.normal(kw, (128, 1), jnp.float32) / jnp.sqrt(128.0)
    params["last_b"] = 0.01 * jax.random.normal(kb, (1,), jnp.float32)
    return params


def masknet_forward(params, x, target_masks=None):
    """x: (N, H, W, in_channels) NHWC -> logits (N, 4H, 4W, 1) NHWC (f32)."""
    h = x.astype(ACT_DTYPE)
    # block1: up x2 -> conv3x3+BN+ReLU -> conv3x3+BN+ReLU
    h = bilinear_up2x(h)
    h = conv3x3_bn_relu(h, *params["b1c1"])
    h = conv3x3_bn_relu(h, *params["b1c2"])
    # block2: up x2 -> conv3x3+BN+ReLU -> conv3x3+BN+ReLU fused with the 1x1-conv head
    h = bilinear_up2x(h)
    h = conv3x3_bn_relu(h, *params["b2c1"])
    logits = conv3x3_bn_relu_head(h, *params["b2c2"],
                                  params["last_w"], params["last_b"])
    if target_masks is not None:
        # BCEWithLogitsLoss (mean reduction) -- tiny scalar reduction, plain JAX.
        z = logits
        loss = jnp.mean(jnp.maximum(z, 0.0) - z * target_masks
                        + jnp.log1p(jnp.exp(-jnp.abs(z))))
        return logits, {"loss_mask": loss}
    return logits


if __name__ == "__main__":
    key = jax.random.PRNGKey(0)
    kx, kp = jax.random.split(key)

    N, H, W, in_channels = 2, 8, 8, 6            # small deterministic example
    x = jax.random.normal(kx, (N, H, W, in_channels), jnp.float32)
    params = init_masknet_params(kp, in_channels)

    y = masknet_forward(params, x)
    y = jax.block_until_ready(y)
    assert y.shape == (N, 4 * H, 4 * W, 1), y.shape
    assert bool(jnp.all(jnp.isfinite(y)))
    print("KERNEL_OK")
</pallas_src>

<mosaic_0001>
module attributes {stable_mosaic.version = 11 : i64} {
  func.func @kernel(%arg0: i32, %arg1: memref<16x8xbf16, #tpu.memory_space<vmem>>, %arg2: memref<1x8x48xbf16, #tpu.memory_space<vmem>>, %arg3: memref<1x16x96xbf16, #tpu.memory_space<vmem>>) attributes {dimension_semantics = [#tpu.dimension_semantics<parallel>], iteration_bounds = array<i64: 2>, scalar_prefetch = 0 : i64, scratch_operands = 0 : i64, tpu.core_type = #tpu.core_type<tc>, window_params = [{pipeline_mode = #tpu.pipeline_mode<synchronous>, transform_indices = @transform_0, window_bounds = array<i64: 16, 8>}, {transform_indices = @transform_1, window_bounds = array<i64: 1, 8, 48>}, {transform_indices = @transform_2, window_bounds = array<i64: 1, 16, 96>}]} {
    %c0 = arith.constant 0 : index
    %c0_0 = arith.constant 0 : index
    %0 = vector.load %arg1[%c0, %c0_0] : memref<16x8xbf16, #tpu.memory_space<vmem>>, vector<16x8xbf16>
    %c0_1 = arith.constant 0 : index
    %c0_2 = arith.constant 0 : index
    %c0_3 = arith.constant 0 : index
    %1 = vector.load %arg2[%c0_1, %c0_2, %c0_3] : memref<1x8x48xbf16, #tpu.memory_space<vmem>>, vector<1x8x48xbf16>
    %2 = vector.shape_cast %1 : vector<1x8x48xbf16> to vector<8x48xbf16>
    %cst = arith.constant dense<0.000000e+00> : vector<16x48xf32>
    %3 = tpu.matmul %0, %2, %cst {dimension_numbers = #tpu.dot_dimension_numbers<[1], [0], [0], [1], [0, 0, 1, 1], [], []>} : vector<16x8xbf16>, vector<8x48xbf16>, vector<16x48xf32> -> vector<16x48xf32>
    %4 = vector.extract_strided_slice %3 {offsets = [0, 0], sizes = [16, 6], strides = [1, 1]} : vector<16x48xf32> to vector<16x6xf32>
    %5 = vector.extract_strided_slice %3 {offsets = [0, 0], sizes = [16, 6], strides = [1, 1]} : vector<16x48xf32> to vector<16x6xf32>
    %6 = vector.extract_strided_slice %3 {offsets = [0, 6], sizes = [16, 6], strides = [1, 1]} : vector<16x48xf32> to vector<16x6xf32>
    %cst_4 = arith.constant 0.533333302 : f32
    %7 = vector.broadcast %cst_4 : f32 to vector<16x6xf32>
    %8 = arith.mulf %7, %5 : vector<16x6xf32>
    %cst_5 = arith.constant 0.466666669 : f32
    %9 = vector.broadcast %cst_5 : f32 to vector<16x6xf32>
    %10 = arith.mulf %9, %6 : vector<16x6xf32>
    %11 = arith.addf %8, %10 : vector<16x6xf32>
    %12 = vector.extract_strided_slice %3 {offsets = [0, 0], sizes = [16, 6], strides = [1, 1]} : vector<16x48xf32> to vector<16x6xf32>
    %13 = vector.extract_strided_slice %3 {offsets = [0, 6], sizes = [16, 6], strides = [1, 1]} : vector<16x48xf32> to vector<16x6xf32>
    %cst_6 = arith.constant 0.0666666627 : f32
    %14 = vector.broadcast %cst_6 : f32 to vector<16x6xf32>
    %15 = arith.mulf %14, %12 : vector<16x6xf32>
    %cst_7 = arith.constant 0.933333337 : f32
    %16 = vector.broadcast %cst_7 : f32 to vector<16x6xf32>
    %17 = arith.mulf %16, %13 : vector<16x6xf32>
    %18 = arith.addf %15, %17 : vector<16x6xf32>
    %19 = vector.extract_strided_slice %3 {offsets = [0, 6], sizes = [16, 6], strides = [1, 1]} : vector<16x48xf32> to vector<16x6xf32>
    %20 = vector.extract_strided_slice %3 {offsets = [0, 12], sizes = [16, 6], strides = [1, 1]} : vector<16x48xf32> to vector<16x6xf32>
    %cst_8 = arith.constant 6.000000e-01 : f32
    %21 = vector.broadcast %cst_8 : f32 to vector<16x6xf32>
    %22 = arith.mulf %21, %19 : vector<16x6xf32>
    %cst_9 = arith.constant 4.000000e-01 : f32
    %23 = vector.broadcast %cst_9 : f32 to vector<16x6xf32>
    %24 = arith.mulf %23, %20 : vector<16x6xf32>
    %25 = arith.addf %22, %24 : vector<16x6xf32>
    %26 = vector.extract_strided_slice %3 {offsets = [0, 6], sizes = [16, 6], strides = [1, 1]} : vector<16x48xf32> to vector<16x6xf32>
    %27 = vector.extract_strided_slice %3 {offsets = [0, 12], sizes = [16, 6], strides = [1, 1]} : vector<16x48xf32> to vector<16x6xf32>
    %cst_10 = arith.constant 0.133333325 : f32
    %28 = vector.broadcast %cst_10 : f32 to vector<16x6xf32>
    %29 = arith.mulf %28, %26 : vector<16x6xf32>
    %cst_11 = arith.constant 0.866666674 : f32
    %30 = vector.broadcast %cst_11 : f32 to vector<16x6xf32>
    %31 = arith.mulf %30, %27 : vector<16x6xf32>
    %32 = arith.addf %29, %31 : vector<16x6xf32>
    %33 = vector.extract_strided_slice %3 {offsets = [0, 12], sizes = [16, 6], strides = [1, 1]} : vector<16x48xf32> to vector<16x6xf32>
    %34 = vector.extract_strided_slice %3 {offsets = [0, 18], sizes = [16, 6], strides = [1, 1]} : vector<16x48xf32> to vector<16x6xf32>
    %cst_12 = arith.constant 0.666666627 : f32
    %35 = vector.broadcast %cst_12 : f32 to vector<16x6xf32>
    %36 = arith.mulf %35, %33 : vector<16x6xf32>
    %cst_13 = arith.constant 0.333333343 : f32
    %37 = vector.broadcast %cst_13 : f32 to vector<16x6xf32>
    %38 = arith.mulf %37, %34 : vector<16x6xf32>
    %39 = arith.addf %36, %38 : vector<16x6xf32>
    %40 = vector.extract_strided_slice %3 {offsets = [0, 12], sizes = [16, 6], strides = [1, 1]} : vector<16x48xf32> to vector<16x6xf32>
    %41 = vector.extract_strided_slice %3 {offsets = [0, 18], sizes = [16, 6], strides = [1, 1]} : vector<16x48xf32> to vector<16x6xf32>
    %cst_14 = arith.constant 0.199999988 : f32
    %42 = vector.broadcast %cst_14 : f32 to vector<16x6xf32>
    %43 = arith.mulf %42, %40 : vector<16x6xf32>
    %cst_15 = arith.constant 8.000000e-01 : f32
    %44 = vector.broadcast %cst_15 : f32 to vector<16x6xf32>
    %45 = arith.mulf %44, %41 : vector<16x6xf32>
    %46 = arith.addf %43, %45 : vector<16x6xf32>
    %47 = vector.extract_strided_slice %3 {offsets = [0, 18], sizes = [16, 6], strides = [1, 1]} : vector<16x48xf32> to vector<16x6xf32>
    %48 = vector.extract_strided_slice %3 {offsets = [0, 24], sizes = [16, 6], strides = [1, 1]} : vector<16x48xf32> to vector<16x6xf32>
    %cst_16 = arith.constant 0.733333349 : f32
    %49 = vector.broadcast %cst_16 : f32 to vector<16x6xf32>
    %50 = arith.mulf %49, %47 : vector<16x6xf32>
    %cst_17 = arith.constant 0.266666681 : f32
    %51 = vector.broadcast %cst_17 : f32 to vector<16x6xf32>
    %52 = arith.mulf %51, %48 : vector<16x6xf32>
    %53 = arith.addf %50, %52 : vector<16x6xf32>
    %54 = vector.extract_strided_slice %3 {offsets = [0, 18], sizes = [16, 6], strides = [1, 1]} : vector<16x48xf32> to vector<16x6xf32>
    %55 = vector.extract_strided_slice %3 {offsets = [0, 24], sizes = [16, 6], strides = [1, 1]} : vector<16x48xf32> to vector<16x6xf32>
    %cst_18 = arith.constant 0.266666651 : f32
    %56 = vector.broadcast %cst_18 : f32 to vector<16x6xf32>
    %57 = arith.mulf %56, %54 : vector<16x6xf32>
    %cst_19 = arith.constant 0.733333349 : f32
    %58 = vector.broadcast %cst_19 : f32 to vector<16x6xf32>
    %59 = arith.mulf %58, %55 : vector<16x6xf32>
    %60 = arith.addf %57, %59 : vector<16x6xf32>
    %61 = vector.extract_strided_slice %3 {offsets = [0, 24], sizes = [16, 6], strides = [1, 1]} : vector<16x48xf32> to vector<16x6xf32>
    %62 = vector.extract_strided_slice %3 {offsets = [0, 30], sizes = [16, 6], strides = [1, 1]} : vector<16x48xf32> to vector<16x6xf32>
    %cst_20 = arith.constant 8.000000e-01 : f32
    %63 = vector.broadcast %cst_20 : f32 to vector<16x6xf32>
    %64 = arith.mulf %63, %61 : vector<16x6xf32>
    %cst_21 = arith.constant 2.000000e-01 : f32
    %65 = vector.broadcast %cst_21 : f32 to vector<16x6xf32>
    %66 = arith.mulf %65, %62 : vector<16x6xf32>
    %67 = arith.addf %64, %66 : vector<16x6xf32>
    %68 = vector.extract_strided_slice %3 {offsets = [0, 24], sizes = [16, 6], strides = [1, 1]} : vector<16x48xf32> to vector<16x6xf32>
    %69 = vector.extract_strided_slice %3 {offsets = [0, 30], sizes = [16, 6], strides = [1, 1]} : vector<16x48xf32> to vector<16x6xf32>
    %cst_22 = arith.constant 0.333333313 : f32
    %70 = vector.broadcast %cst_22 : f32 to vector<16x6xf32>
    %71 = arith.mulf %70, %68 : vector<16x6xf32>
    %cst_23 = arith.constant 0.666666686 : f32
    %72 = vector.broadcast %cst_23 : f32 to vector<16x6xf32>
    %73 = arith.mulf %72, %69 : vector<16x6xf32>
    %74 = arith.addf %71, %73 : vector<16x6xf32>
    %75 = vector.extract_strided_slice %3 {offsets = [0, 30], sizes = [16, 6], strides = [1, 1]} : vector<16x48xf32> to vector<16x6xf32>
    %76 = vector.extract_strided_slice %3 {offsets = [0, 36], sizes = [16, 6], strides = [1, 1]} : vector<16x48xf32> to vector<16x6xf32>
    %cst_24 = arith.constant 0.866666674 : f32
    %77 = vector.broadcast %cst_24 : f32 to vector<16x6xf32>
    %78 = arith.mulf %77, %75 : vector<16x6xf32>
    %cst_25 = arith.constant 0.13333334 : f32
    %79 = vector.broadcast %cst_25 : f32 to vector<16x6xf32>
    %80 = arith.mulf %79, %76 : vector<16x6xf32>
    %81 = arith.addf %78, %80 : vector<16x6xf32>
    %82 = vector.extract_strided_slice %3 {offsets = [0, 30], sizes = [16, 6], strides = [1, 1]} : vector<16x48xf32> to vector<16x6xf32>
    %83 = vector.extract_strided_slice %3 {offsets = [0, 36], sizes = [16, 6], strides = [1, 1]} : vector<16x48xf32> to vector<16x6xf32>
    %cst_26 = arith.constant 0.399999976 : f32
    %84 = vector.broadcast %cst_26 : f32 to vector<16x6xf32>
    %85 = arith.mulf %84, %82 : vector<16x6xf32>
    %cst_27 = arith.constant 6.000000e-01 : f32
    %86 = vector.broadcast %cst_27 : f32 to vector<16x6xf32>
    %87 = arith.mulf %86, %83 : vector<16x6xf32>
    %88 = arith.addf %85, %87 : vector<16x6xf32>
    %89 = vector.extract_strided_slice %3 {offsets = [0, 36], sizes = [16, 6], strides = [1, 1]} : vector<16x48xf32> to vector<16x6xf32>
    %90 = vector.extract_strided_slice %3 {offsets = [0, 42], sizes = [16, 6], strides = [1, 1]} : vector<16x48xf32> to vector<16x6xf32>
    %cst_28 = arith.constant 0.933333337 : f32
    %91 = vector.broadcast %cst_28 : f32 to vector<16x6xf32>
    %92 = arith.mulf %91, %89 : vector<16x6xf32>
    %cst_29 = arith.constant 0.0666666701 : f32
    %93 = vector.broadcast %cst_29 : f32 to vector<16x6xf32>
    %94 = arith.mulf %93, %90 : vector<16x6xf32>
    %95 = arith.addf %92, %94 : vector<16x6xf32>
    %96 = vector.extract_strided_slice %3 {offsets = [0, 36], sizes = [16, 6], strides = [1, 1]} : vector<16x48xf32> to vector<16x6xf32>
    %97 = vector.extract_strided_slice %3 {offsets = [0, 42], sizes = [16, 6], strides = [1, 1]} : vector<16x48xf32> to vector<16x6xf32>
    %cst_30 = arith.constant 0.466666639 : f32
    %98 = vector.broadcast %cst_30 : f32 to vector<16x6xf32>
    %99 = arith.mulf %98, %96 : vector<16x6xf32>
    %cst_31 = arith.constant 0.533333361 : f32
    %100 = vector.broadcast %cst_31 : f32 to vector<16x6xf32>
    %101 = arith.mulf %100, %97 : vector<16x6xf32>
    %102 = arith.addf %99, %101 : vector<16x6xf32>
    %103 = vector.extract_strided_slice %3 {offsets = [0, 42], sizes = [16, 6], strides = [1, 1]} : vector<16x48xf32> to vector<16x6xf32>
    %104 = tpu.concatenate %4, %11, %18, %25, %32, %39, %46, %53, %60, %67, %74, %81, %88, %95, %102, %103 in 1 : vector<16x6xf32>, vector<16x6xf32>, vector<16x6xf32>, vector<16x6xf32>, vector<16x6xf32>, vector<16x6xf32>, vector<16x6xf32>, vector<16x6xf32>, vector<16x6xf32>, vector<16x6xf32>, vector<16x6xf32>, vector<16x6xf32>, vector<16x6xf32>, vector<16x6xf32>, vector<16x6xf32>, vector<16x6xf32> -> vector<16x96xf32>
    %105 = arith.truncf %104 : vector<16x96xf32> to vector<16x96xbf16>
    %c0_32 = arith.constant 0 : index
    %c0_33 = arith.constant 0 : index
    %c0_34 = arith.constant 0 : index
    %106 = vector.load %arg3[%c0_32, %c0_33, %c0_34] : memref<1x16x96xbf16, #tpu.memory_space<vmem>>, vector<1x16x96xbf16>
    %107 = vector.shape_cast %106 : vector<1x16x96xbf16> to vector<16x96xbf16>
    %108 = vector.shape_cast %105 : vector<16x96xbf16> to vector<1x16x96xbf16>
    tpu.vector_store %arg3[%c0_32, %c0_33, %c0_34], %108 {strides = array<i32>} : memref<1x16x96xbf16, #tpu.memory_space<vmem>>, vector<1x16x96xbf16>,
    return
  }
  func.func @transform_0(%arg0: i32) -> (i32, i32) {
    %c0_i32 = arith.constant 0 : i32
    %c0_i32_0 = arith.constant 0 : i32
    %c0_i32_1 = arith.constant 0 : i32
    return %c0_i32, %c0_i32_0 : i32, i32
  }
  func.func @transform_1(%arg0: i32) -> (i32, i32, i32) {
    %c0_i32 = arith.constant 0 : i32
    %c0_i32_0 = arith.constant 0 : i32
    %c0_i32_1 = arith.constant 0 : i32
    return %arg0, %c0_i32, %c0_i32_0 : i32, i32, i32
  }
  func.func @transform_2(%arg0: i32) -> (i32, i32, i32) {
    %c0_i32 = arith.constant 0 : i32
    %c0_i32_0 = arith.constant 0 : i32
    %c0_i32_1 = arith.constant 0 : i32
    return %arg0, %c0_i32, %c0_i32_0 : i32, i32, i32
  }
}

</mosaic_0001>

<bundles_post_ra>
// kernel: tpu_custom_call.1
= control target key start
LH: loop header
LB: loop body
LE: loop exit
PB: predicated region body
PF: predicated region fallthrough
CT: control target
= control target key end

     0   :  { %7 = vsyncpa [#allocation3], 0  ;;  %s1068_s0 = inlined_call_operand.vmem [shape: bf16[16,8], index: 0, kind: input, shape index: {}]   ;;  %s1069_s1 = inlined_call_operand.vmem [shape: bf16[2,8,48], index: 1, kind: input, shape index: {}]   ;;  %s1070_s2 = inlined_call_operand.hbm [shape: bf16[2,16,96], index: 2, kind: output, shape index: {}]  }
   0x1   :  { %9 = vsyncpa [#allocation3 + $0x1], 0  ;;  %s837_s9 = smov 0   ;;  %s839_s10 = smov 0  }
   0x2   :  { %s841_s11 = smov 0   ;;  %s843_s12 = smov 0  }
   0x3 LB: > { %s858_s13 = sadd.s32 4294967295, %s809_s12   ;;  %s604_s14 = sadd.s32 4294967294, %s809_s12   ;;  %s809_s12 = sphi %s843_s12, %s1076_s12   ;;  %s805_s11 = sphi %s841_s11, %s1075_s11   ;;  %s801_s10 = sphi %s839_s10, %s1074_s10   ;;  %s797_s9 = sphi %s837_s9, %s1073_s9  }
   0x4   : > { %s862_s15 = sadd.s32 1, %s809_s12   ;;  %s69_s16 = sadd.s32 1, %s805_s11 }
   0x5   : > { %s66_s17 = ssub.s32 %s809_s12, %s862_s15  ;;  %p79_p0 = scmp.ne.s32.totalorder %s805_s11, %s801_s10 }
   0x6   : > { %p67_p1 = scmp.eq.s32.totalorder %s66_s17, 0  ;;  %p80_p2 = scmp.eq.s32.totalorder %s858_s13, 1 }
   0x7   : > { %p85_p3 = scmp.ne.s32.totalorder %s801_s10, %s797_s9  ;;  %p86_p4 = scmp.eq.s32.totalorder %s604_s14, 1 }
   0x8   : > { %s873_s18 = scalar_select %p67_p1, %s805_s11, %s69_s16  }
   0x9   : > { %p875_p5 = por %p80_p2, %p79_p0  ;;  %p879_p6 = por %p86_p4, %p85_p3 }
   0xa   : > { %p607_p7 = scmp.ge.s32.totalorder %s809_s12, 1  ;;  %p114_p8 = scmp.lt.s32.totalorder %s809_s12, 3 }
   0xc   : > { %p115_p9 = pnand %p607_p7, %p114_p8 }
   0xd   : > { %p135_p10 = scmp.lt.s32.totalorder (!%p115_p9), %s858_s13, 1  ;;  %s811_s28 = smov (!%p115_p9), 122  }
   0xe   : > { %118 = sbr.rel (%p115_p9) target bundleno = 475 (0x1db), region = 28  ;;  %s812_s29 = smov (!%p115_p9), 12  }
   0xf   : > { %s813_s30 = smov (!%p115_p9), 24   ;;  %s814_s3 = smov (!%p115_p9), 30  }
  0x10   : > { %s815_s4 = smov (!%p115_p9), 42   ;;  %s816_s5 = smov (!%p115_p9), 48  }
  0x11   : > { %s817_s6 = smov (!%p115_p9), 6   ;;  %s818_s7 = smov (!%p115_p9), 18  }
  0x12   : > { %s819_s8 = smov (!%p115_p9), 36   ;;  %s132_s14 = sand.u32 (!%p115_p9), 1, %s801_s10  }
  0x13   : > { %s136_s21 = scalar_select %p135_p10, %s858_s13, 1  ;;  %vm152_vm0 = vcmask 1043456   ;;  %v620_v2 = vld [vmem:[%s1068_s0] sm:$0xff]  ;;  %vm148_vm1 = vcmask 64512   ;;  %vm476_vm2 = vcmask 48128   ;;  %vm479_vm3 = vcmask 97280  }
  0x14   : > { %vm482_vm4 = vcmask 146432   ;;  %vm485_vm5 = vcmask 195584   ;;  %vm488_vm6 = vcmask 244736   ;;  %vm491_vm7 = vcmask 293888   ;;  %s608_s16 = sshll.u32 %s132_s14, 3  ;;  %s621_s17 = sshll.u32 %s858_s13, 3 }
  0x15   : > { %s609_s22 = sshll.u32 %s136_s21, 2  ;;  %vm494_vm8 = vcmask 343040   ;;  %vm497_vm9 = vcmask 392192   ;;  %vm500_vm10 = vcmask 441344   ;;  %vm503_vm11 = vcmask 490496   ;;  %s538_s23 = scalar_lea.hbm %s1070_s2, %s621_s17 }
  0x16   : > { %s138_s25 = scalar_lea.vmem %s1069_s1, %s609_s22  ;;  %vm506_vm12 = vcmask 539648   ;;  %vm509_vm13 = vcmask 588800   ;;  %vm512_vm14 = vcmask 637952   ;;  %vm515_vm15 = vcmask 687104   ;;  %s134_s13 = scalar_lea.vmem [#allocation2], %s608_s16 }
  0x17   : > { %v142_v0 = vld [vmem:[%s138_s25] sm:$0xf]  ;;  %s539_s24 = sshll.u32 %s134_s13, 4  ;;  %s541_s25 = sshll.u32 %s538_s23, 4  ;;  %s540_s24 = int_to_ptr.vmem [resolvable:$true] %s539_s24  ;;  %s542_s25 = int_to_ptr.hbm [resolvable:$true] %s541_s25 }
  0x18   : > { %v154_v1 = vsel %vm152_vm0, %v142_v0, 0  ;;  %vm518_vm0 = vcmask 736256   ;;  %s527_s26 = scalar_lea.sflag [#allocation3], %s132_s14  ;;  %s761_s27 = sshra.s32 %s542_s25, 4  ;;  %s762_s27 = int_to_ptr.hbm [resolvable:$true] %s761_s27 }
  0x19   : > { %163 = vmatpush.bf16.msra.mxu0 %v154_v1  ;;  %p768_p0 = scmp.lt.s32.totalorder %s762_s27, %s1070_s2 }
  0x1c   : > { %614 = vmatmul.msk.bf16.vlgmr.msra.gmra.mxu0 %vm148_vm1, %v620_v2  ;;  %vm523_vm1 = vcmask 781312  }
  0x99   : > { %v893_v3 = vpop.f32.mrf.mxu0 }
  0x9a   : > { %v200_v4 = vmul.f32 0.4, %v893_v3  ;;  %v897_v5 = vmul.f32 0.93333334, %v893_v3  ;;  %v172_v6 = vmul.f32 0.46666667, %v893_v3 }
  0x9b   : > { %v228_v7 = vmul.f32 0.33333334, %v893_v3  ;;  %v906_v8 = vmul.f32 0.8, %v893_v3  ;;  %v909_v9 = vmul.f32 0.8666667, %v893_v3 }
  0x9c   : > { %204 = vrot.lane.b32.xlu2 %v200_v4, %s811_s28  ;;  %190 = vrot.lane.b32.xlu1 %v897_v5, %s811_s28  ;;  %v917_v10 = vmul.f32 0.73333335, %v893_v3  ;;  %v280_v11 = vmul.f32 0.2, %v893_v3  ;;  %v256_v12 = vmul.f32 0.26666668, %v893_v3 }
  0x9d   : > { %176 = vrot.lane.b32.xlu0 %v172_v6, %s811_s28  ;;  %v306_v13 = vmul.f32 0.13333334, %v893_v3  ;;  %v198_v14 = vmul.f32 0.6, %v893_v3  ;;  %v294_v15 = vmul.f32 0.6666667, %v893_v3 }
  0x9e   : > { %v330_v19 = vmul.f32 0.06666667, %v893_v3  ;;  %v344_v29 = vmul.f32 0.53333336, %v893_v3  ;;  %v240_v45 = vmul.f32 0.19999999, %v893_v3 }
  0x9f   : > { %v184_v59 = vmul.f32 0.06666666, %v893_v3  ;;  %v318_v60 = vmul.f32 0.39999998, %v893_v3 }
  0xa1   : > { %v931_v16 = vpop.f32.mrf.mxu0 }
  0xa2   : > { %v201_v17 = vmul.f32 0.4, %v931_v16  ;;  %v935_v18 = vmul.f32 0.93333334, %v931_v16  ;;  %v243_v20 = vmul.f32 0.8, %v931_v16 }
  0xa3   : > { %v944_v21 = vmul.f32 0.8666667, %v931_v16  ;;  %v173_v22 = vmul.f32 0.46666667, %v931_v16  ;;  %v281_v23 = vmul.f32 0.2, %v931_v16 }
  0xa4   : > { %232 = vrot.lane.b32.xlu2 %v228_v7, %s811_s28  ;;  %246 = vrot.lane.b32.xlu1 %v906_v8, %s811_s28  ;;  %v257_v24 = vmul.f32 0.26666668, %v931_v16  ;;  %v229_v25 = vmul.f32 0.33333334, %v931_v16  ;;  %v199_v26 = vmul.f32 0.6, %v931_v16 }
  0xa5   : > { %218 = vrot.lane.b32.xlu0 %v909_v9, %s811_s28  ;;  %v295_v27 = vmul.f32 0.6666667, %v931_v16  ;;  %v960_v28 = vmul.f32 0.73333335, %v931_v16  ;;  %v331_v30 = vmul.f32 0.06666667, %v931_v16 }
  0xa6   : > { %v307_v31 = vmul.f32 0.13333334, %v931_v16  ;;  %v345_v32 = vmul.f32 0.53333336, %v931_v16  ;;  %v241_v46 = vmul.f32 0.19999999, %v931_v16 }
  0xa7   : > { %v319_v61 = vmul.f32 0.39999998, %v931_v16  ;;  %v185_v62 = vmul.f32 0.06666666, %v931_v16 }
  0xac   : > { %272 = vrot.lane.b32.xlu2 %v917_v10, %s811_s28  ;;  %284 = vrot.lane.b32.xlu1 %v280_v11, %s811_s28 }
  0xad   : > { %260 = vrot.lane.b32.xlu0 %v256_v12, %s811_s28  ;;  %v170_v12 = vmul.f32 0.5333333, %v893_v3 }
  0xb4   : > { %310 = vrot.lane.b32.xlu2 %v306_v13, %s811_s28  ;;  %322 = vrot.lane.b32.xlu1 %v198_v14, %s811_s28 }
  0xb5   : > { %298 = vrot.lane.b32.xlu0 %v294_v15, %s811_s28 }
  0xbc   : > { %206 = vrot.lane.b32.xlu2 %v201_v17, %s811_s28  ;;  %192 = vrot.lane.b32.xlu1 %v935_v18, %s811_s28 }
  0xbd   : > { %334 = vrot.lane.b32.xlu0 %v330_v19, %s811_s28 }
  0xc4   : > { %248 = vrot.lane.b32.xlu2 %v243_v20, %s811_s28  ;;  %220 = vrot.lane.b32.xlu1 %v944_v21, %s811_s28 }
  0xc5   : > { %178 = vrot.lane.b32.xlu0 %v173_v22, %s811_s28 }
  0xcc   : > { %286 = vrot.lane.b32.xlu2 %v281_v23, %s811_s28  ;;  %262 = vrot.lane.b32.xlu1 %v257_v24, %s811_s28  ;;  %v213_v23 = vmul.f32 0.13333333, %v931_v16  ;;  %v226_v24 = vmul.f32 0.6666666, %v893_v3 }
  0xcd   : > { %234 = vrot.lane.b32.xlu0 %v229_v25, %s811_s28  ;;  %v212_v25 = vmul.f32 0.13333333, %v893_v3 }
  0xd4   : > { %324 = vrot.lane.b32.xlu2 %v199_v26, %s811_s28  ;;  %300 = vrot.lane.b32.xlu1 %v295_v27, %s811_s28  ;;  %v227_v27 = vmul.f32 0.6666666, %v931_v16 }
  0xd5   : > { %274 = vrot.lane.b32.xlu0 %v960_v28, %s811_s28 }
  0xdc   : > { %348 = vrot.lane.b32.xlu2 %v344_v29, %s811_s28  ;;  %336 = vrot.lane.b32.xlu1 %v331_v30, %s811_s28 }
  0xdd   : > { %312 = vrot.lane.b32.xlu0 %v307_v31, %s811_s28 }
  0xe5   : > { %350 = vrot.lane.b32.xlu0 %v345_v32, %s811_s28  ;;  %s763_s28 = scalar_lea.hbm %s762_s27, 8 }
  0xe6   : > { %p764_p11 = scmp.ne.s32.totalorder %s762_s27, %s763_s28 }
  0xe8   : > { %p765_p12 = pnand %p764_p11, %p875_p5 }
  0xea   : > { %p766_p13 = pneg %p765_p12 }
  0xf6   : > { %v205_v33 = vpop.permute.xlu2 %204 }
  0xf7   : > { %v210_v41 = vadd.f32 %v205_v33, %v198_v14  ;;  %v171_v14 = vmul.f32 0.5333333, %v931_v16 }
  0xfe   : > { %v974_v34 = vpop.permute.xlu2 %232 }
  0xff   : > { %v238_v31 = vadd.f32 %v974_v34, %v226_v24 }
 0x106   : > { %v976_v35 = vpop.permute.xlu2 %272 }
 0x10e   : > { %v978_v36 = vpop.permute.xlu2 %310  ;;  %v191_v37 = vpop.permute.xlu1 %190 }
 0x10f   : > { %v177_v38 = vpop.permute.xlu0 %176  ;;  %v196_v1 = vadd.f32 %v191_v37, %v184_v59  ;;  %v343_v59 = vmul.f32 0.46666664, %v931_v16 }
 0x110   : > { %v182_v17 = vadd.f32 %v177_v38, %v170_v12 }
 0x116   : > { %v247_v39 = vpop.permute.xlu1 %246  ;;  %v207_v40 = vpop.permute.xlu2 %206 }
 0x117   : > { %v219_v42 = vpop.permute.xlu0 %218  ;;  %v211_v43 = vadd.f32 %v207_v40, %v199_v26  ;;  %v252_v49 = vadd.f32 %v247_v39, %v240_v45  ;;  %v268_v39 = vmul.f32 0.26666665, %v893_v3 }
 0x118   : > { %v224_v32 = vadd.f32 %v219_v42, %v212_v25 }
 0x119   : > { %v682_v44 = vpack.i.bf16 %v211_v43, %v210_v41  ;;  %v269_v41 = vmul.f32 0.26666665, %v931_v16 }
 0x11b   : > { %683 = vrot.lane.b32.xlu0 %v682_v44, %s812_s29  ;;  %v278_v44 = vadd.f32 %v976_v35, %v268_v39 }
 0x11e   : > { %v285_v47 = vpop.permute.xlu1 %284  ;;  %v249_v48 = vpop.permute.xlu2 %248 }
 0x11f   : > { %v261_v50 = vpop.permute.xlu0 %260  ;;  %v253_v51 = vadd.f32 %v249_v48, %v241_v46  ;;  %v290_v55 = vadd.f32 %v285_v47, %v906_v8  ;;  %v293_v48 = vmul.f32 0.3333333, %v931_v16 }
 0x120   : > { %v266_v45 = vadd.f32 %v261_v50, %v917_v10 }
 0x121   : > { %v697_v52 = vpack.i.bf16 %v253_v51, %v252_v49  ;;  %v292_v49 = vmul.f32 0.3333333, %v893_v3 }
 0x123   : > { %698 = vrot.lane.b32.xlu0 %v697_v52, %s813_s30  ;;  %v316_v52 = vadd.f32 %v978_v36, %v909_v9 }
 0x126   : > { %v323_v53 = vpop.permute.xlu1 %322  ;;  %v287_v54 = vpop.permute.xlu2 %286 }
 0x127   : > { %v985_v56 = vpop.permute.xlu0 %298  ;;  %v291_v57 = vadd.f32 %v287_v54, %v243_v20  ;;  %v328_v2 = vadd.f32 %v323_v53, %v318_v60  ;;  %v742_v20 = vpack.i.bf16 %v931_v16, %v893_v3 }
 0x128   : > { %v304_v35 = vadd.f32 %v985_v56, %v292_v49 }
 0x129   : > { %v712_v58 = vpack.i.bf16 %v291_v57, %v290_v55  ;;  %v342_v57 = vmul.f32 0.46666664, %v893_v3 }
 0x12b   : > { %713 = vrot.lane.b32.xlu0 %v712_v58, %s814_s3 }
 0x12e   : > { %v325_v63 = vpop.permute.xlu2 %324  ;;  %v193_v0 = vpop.permute.xlu1 %192 }
 0x12f   : > { %v992_v4 = vpop.permute.xlu0 %334  ;;  %v329_v6 = vadd.f32 %v325_v63, %v319_v61  ;;  %v197_v7 = vadd.f32 %v193_v0, %v185_v62 }
 0x130   : > { %v340_v9 = vadd.f32 %v992_v4, %v897_v5 }
 0x131   : > { %v727_v8 = vpack.i.bf16 %v329_v6, %v328_v2  ;;  %v677_v11 = vpack.i.bf16 %v197_v7, %v196_v1 }
 0x133   : > { %678 = vrot.lane.b32.xlu2 %v677_v11, %s812_s29  ;;  %728 = vrot.lane.b32.xlu0 %v727_v8, %s815_s4 }
 0x136   : > { %v221_v13 = vpop.permute.xlu1 %220  ;;  %v349_v55 = vpop.permute.xlu2 %348 }
 0x137   : > { %v179_v15 = vpop.permute.xlu0 %178  ;;  %v225_v26 = vadd.f32 %v221_v13, %v213_v23  ;;  %v354_v36 = vadd.f32 %v349_v55, %v342_v57 }
 0x138   : > { %v183_v19 = vadd.f32 %v179_v15, %v171_v14 }
 0x139   : > { %v687_v37 = vpack.i.bf16 %v225_v26, %v224_v32 }
 0x13a   : > { %v672_v22 = vpack.i.bf16 %v183_v19, %v182_v17 }
 0x13b   : > { %743 = vrot.lane.b32.xlu0 %v742_v20, %s816_s5 }
 0x13c   : > { %673 = vrot.lane.b32.xlu1 %v672_v22, %s817_s6 }
 0x13e   : > { %v263_v29 = vpop.permute.xlu1 %262 }
 0x13f   : > { %v235_v30 = vpop.permute.xlu0 %234  ;;  %v267_v40 = vadd.f32 %v263_v29, %v960_v28 }
 0x140   : > { %v239_v33 = vadd.f32 %v235_v30, %v227_v27 }
 0x141   : > { %v702_v42 = vpack.i.bf16 %v267_v40, %v266_v45 }
 0x142   : > { %v692_v38 = vpack.i.bf16 %v239_v33, %v238_v31 }
 0x144   : > { %693 = vrot.lane.b32.xlu2 %v692_v38, %s818_s7  ;;  %688 = vrot.lane.b32.xlu1 %v687_v37, %s818_s7 }
 0x146   : > { %v301_v34 = vpop.permute.xlu1 %300 }
 0x147   : > { %v275_v43 = vpop.permute.xlu0 %274  ;;  %v305_v28 = vadd.f32 %v301_v34, %v293_v48 }
 0x148   : > { %v279_v46 = vadd.f32 %v275_v43, %v269_v41 }
 0x149   : > { %v717_v50 = vpack.i.bf16 %v305_v28, %v304_v35 }
 0x14a   : > { %v707_v47 = vpack.i.bf16 %v279_v46, %v278_v44 }
 0x14c   : > { %708 = vrot.lane.b32.xlu2 %v707_v47, %s814_s3  ;;  %703 = vrot.lane.b32.xlu1 %v702_v42, %s813_s30  ;;  %s767_s3 = scalar_lea.hbm %s1070_s2, 16 }
 0x14d   : > { %p769_p1 = scmp.lt.s32.totalorder %s767_s3, %s763_s28 }
 0x14e   : > { %v337_v54 = vpop.permute.xlu1 %336 }
 0x14f   : > { %v313_v51 = vpop.permute.xlu0 %312  ;;  %v341_v58 = vadd.f32 %v337_v54, %v935_v18  ;;  %p770_p2 = por %p769_p1, %p768_p0 }
 0x150   : > { %v317_v10 = vadd.f32 %v313_v51, %v944_v21 }
 0x151   : > { %v732_v21 = vpack.i.bf16 %v341_v58, %v340_v9  ;;  %p771_p3 = pnand %p770_p2, %p766_p13 }
 0x152   : > { %v722_v53 = vpack.i.bf16 %v317_v10, %v316_v52 }
 0x154   : > { %723 = vrot.lane.b32.xlu2 %v722_v53, %s819_s8  ;;  %718 = vrot.lane.b32.xlu1 %v717_v50, %s819_s8 }
 0x157   : > { %v351_v60 = vpop.permute.xlu0 %350 }
 0x158   : > { %v355_v56 = vadd.f32 %v351_v60, %v343_v59 }
 0x15a   : > { %v737_v61 = vpack.i.bf16 %v355_v56, %v354_v36 }
 0x15c   : > { %738 = vrot.lane.b32.xlu2 %v737_v61, %s816_s5  ;;  %733 = vrot.lane.b32.xlu1 %v732_v21, %s815_s4 }
 0x18d   : > { %v684_v62 = vpop.permute.xlu0 %683  ;;  %v679_v63 = vpop.permute.xlu2 %678 }
 0x18e   : > { %v681_v4 = vunpack.i.h.bf16 %v679_v63  ;;  %v680_v8 = vunpack.i.l.bf16 %v679_v63  ;;  %v686_v17 = vunpack.i.h.bf16 %v684_v62  ;;  %v685_v19 = vunpack.i.l.bf16 %v684_v62 }
 0x195   : > { %v699_v2 = vpop.permute.xlu0 %698 }
 0x196   : > { %v701_v33 = vunpack.i.h.bf16 %v699_v2  ;;  %v700_v37 = vunpack.i.l.bf16 %v699_v2 }
 0x19d   : > { %v714_v22 = vpop.permute.xlu0 %713 }
 0x19e   : > { %v694_v1 = vpop.permute.xlu2 %693  ;;  %v716_v34 = vunpack.i.h.bf16 %v714_v22  ;;  %v715_v49 = vunpack.i.l.bf16 %v714_v22 }
 0x19f   : > { %v696_v26 = vunpack.i.h.bf16 %v694_v1 }
 0x1a5   : > { %v729_v46 = vpop.permute.xlu0 %728 }
 0x1a6   : > { %v709_v20 = vpop.permute.xlu2 %708  ;;  %v731_v59 = vunpack.i.h.bf16 %v729_v46  ;;  %v730_v60 = vunpack.i.l.bf16 %v729_v46 }
 0x1a7   : > { %v711_v44 = vunpack.i.h.bf16 %v709_v20  ;;  %v710_v45 = vunpack.i.l.bf16 %v709_v20 }
 0x1ad   : > { %v744_v9 = vpop.permute.xlu0 %743 }
 0x1ae   : > { %v674_v0 = vpop.permute.xlu1 %673  ;;  %v724_v40 = vpop.permute.xlu2 %723  ;;  %v745_v2 = vunpack.i.l.bf16 %v744_v9 }
 0x1af   : > { %v676_v18 = vunpack.i.h.bf16 %v674_v0  ;;  %v675_v6 = vunpack.i.l.bf16 %v674_v0  ;;  %v726_v53 = vunpack.i.h.bf16 %v724_v40  ;;  %v725_v54 = vunpack.i.l.bf16 %v724_v40 }
 0x1b1   : > { %v478_v7 = vsel %vm476_vm2, %v931_v16, %v676_v18  ;;  %v477_v5 = vsel %vm476_vm2, %v893_v3, %v675_v6  ;;  %v695_v3 = vunpack.i.l.bf16 %v694_v1  ;;  %v746_v1 = vunpack.i.h.bf16 %v744_v9 }
 0x1b2   : > { %v481_v12 = vsel %vm479_vm3, %v478_v7, %v681_v4  ;;  %v480_v13 = vsel %vm479_vm3, %v477_v5, %v680_v8 }
 0x1b3   : > { %v483_v23 = vsel %vm482_vm4, %v480_v13, %v685_v19  ;;  %v484_v24 = vsel %vm482_vm4, %v481_v12, %v686_v17 }
 0x1b6   : > { %v689_v11 = vpop.permute.xlu1 %688  ;;  %v739_v55 = vpop.permute.xlu2 %738 }
 0x1b7   : > { %v691_v14 = vunpack.i.h.bf16 %v689_v11  ;;  %v690_v15 = vunpack.i.l.bf16 %v689_v11  ;;  %v741_v61 = vunpack.i.h.bf16 %v739_v55  ;;  %v740_v62 = vunpack.i.l.bf16 %v739_v55 }
 0x1b9   : > { %v486_v25 = vsel %vm485_vm5, %v483_v23, %v690_v15  ;;  %v487_v16 = vsel %vm485_vm5, %v484_v24, %v691_v14 }
 0x1ba   : > { %v489_v29 = vsel %vm488_vm6, %v486_v25, %v695_v3  ;;  %v490_v30 = vsel %vm488_vm6, %v487_v16, %v696_v26 }
 0x1bb   : > { %v492_v38 = vsel %vm491_vm7, %v489_v29, %v700_v37  ;;  %v493_v39 = vsel %vm491_vm7, %v490_v30, %v701_v33 }
 0x1be   : > { %v704_v27 = vpop.permute.xlu1 %703 }
 0x1bf   : > { %v706_v31 = vunpack.i.h.bf16 %v704_v27  ;;  %v705_v32 = vunpack.i.l.bf16 %v704_v27 }
 0x1c1   : > { %v495_v41 = vsel %vm494_vm8, %v492_v38, %v705_v32  ;;  %v496_v43 = vsel %vm494_vm8, %v493_v39, %v706_v31 }
 0x1c2   : > { %v498_v42 = vsel %vm497_vm9, %v495_v41, %v710_v45  ;;  %v499_v47 = vsel %vm497_vm9, %v496_v43, %v711_v44 }
 0x1c3   : > { %v501_v52 = vsel %vm500_vm10, %v498_v42, %v715_v49  ;;  %v502_v35 = vsel %vm500_vm10, %v499_v47, %v716_v34 }
 0x1c6   : > { %v719_v48 = vpop.permute.xlu1 %718 }
 0x1c7   : > { %v721_v28 = vunpack.i.h.bf16 %v719_v48  ;;  %v720_v51 = vunpack.i.l.bf16 %v719_v48 }
 0x1c9   : > { %v504_v10 = vsel %vm503_vm11, %v501_v52, %v720_v51  ;;  %v505_v50 = vsel %vm503_vm11, %v502_v35, %v721_v28 }
 0x1ca   : > { %v507_v57 = vsel %vm506_vm12, %v504_v10, %v725_v54  ;;  %v508_v58 = vsel %vm506_vm12, %v505_v50, %v726_v53 }
 0x1cb   : > { %v510_v63 = vsel %vm509_vm13, %v507_v57, %v730_v60  ;;  %v511_v0 = vsel %vm509_vm13, %v508_v58, %v731_v59 }
 0x1ce   : > { %v734_v36 = vpop.permute.xlu1 %733 }
 0x1cf   : > { %v736_v56 = vunpack.i.h.bf16 %v734_v36  ;;  %v735_v21 = vunpack.i.l.bf16 %v734_v36 }
 0x1d1   : > { %v513_v18 = vsel %vm512_vm14, %v510_v63, %v735_v21  ;;  %v514_v6 = vsel %vm512_vm14, %v511_v0, %v736_v56 }
 0x1d2   : > { %v516_v7 = vsel %vm515_vm15, %v513_v18, %v740_v62  ;;  %v517_v5 = vsel %vm515_vm15, %v514_v6, %v741_v61 }
 0x1d3   : > { %v519_v4 = vsel %vm518_vm0, %v516_v7, %v745_v2  ;;  %v520_v8 = vsel %vm518_vm0, %v517_v5, %v746_v1 }
 0x1d4   : > { %v521_v11 = vpack.c.bf16 %v519_v4, %v519_v4  ;;  %v522_v12 = vpack.c.bf16 %v520_v8, %v520_v8 }
 0x1d6   : > { %524 = vst.msk [vmem:[%s134_s13] sm:$0xf] %vm523_vm1, %v521_v11 }
 0x1d7   : > { %525 = vst.msk [vmem:[%s134_s13 + $0x4] sm:$0xf] %vm523_vm1, %v522_v12 }
 0x1d8   : > { %774 = shalt.err (!%p771_p3)
}
 0x1d9   : > { %s820_s6 = smov 64   ;;  %s821_s7 = smov 4  }
 0x1da   : > { %622 = dma.vmem_to_hbm [thread:$0]  (%p875_p5), %s540_s24, 128, %s542_s25, %s527_s26, %s820_s6, %s820_s6, %s821_s7  }
 0x1db PF: > { %p628_p4 = scmp.ge.s32.totalorder %s809_s12, 2  ;;  %s556_s8 = sand.u32 1, %s797_s9  }
 0x1dc   : > { %s557_s14 = scalar_lea.sflag [#allocation3], %s556_s8 }
 0x1dd   : > { %p625_p7 = pnand %p628_p4, %p879_p6 }
 0x1df   : > { %p626_p8 = pneg %p625_p7 }
 0x1e1   : > { %792 = dma.done.wait (%p626_p8), %s557_s14, 128  }
 0x1e2   : > { %794 = vsyncadd (%p626_p8), %s557_s14, 4294967168  ;;  %p12_p9 = scmp.ge.s32.totalorder %s862_s15, 4   ;;  %s1073_s9 = smov %s801_s10 }
 0x1e3   : > { %s1074_s10 = smov %s805_s11  ;;  %s1075_s11 = smov %s873_s18 }
 0x1e4   : > { %s1076_s12 = smov %s862_s15  ;;  %14 = sbr.rel (!%p12_p9) target bundleno = 3 (0x3), region = 63 }
 0x1e9   :  { %563 = vsyncpa [#allocation3], 1 }
 0x1ea   :  { %565 = vsyncpa [#allocation3 + $0x1], 1 }

</bundles_post_ra>
